<compile_context>
chip_gen: v6e
topology: v6e:2x2x1
jax: 0.10.0
libtpu: 0.0.40
codegen_flags: <defaults>
</compile_context>

<pallas_src>
import jax
import jax.numpy as jnp
from jax.experimental import pallas as pl
from jax.experimental.pallas import tpu as pltpu


def _round_up(n, m):
    return (n + m - 1) // m * m


def _mlp_kernel(x_ref, w1_ref, b1_ref, w2_ref, o_ref):
    """One batch tile of fc2(ReLU(fc1(x))) on `pack`-sample packed rows.

    x_ref : (TR, pack*D)      f32   -- pack consecutive samples per row
    w1_ref: (pack*D, pack*H)  bf16  -- block-diagonal fc1 weight (resident)
    b1_ref: (1, pack*H)       f32   -- fc1 bias tiled pack times
    w2_ref: (pack*H, pack)    bf16  -- block-diagonal fc2 weight (resident)
    o_ref : (TR, pack)        f32   -- fc2 pre-bias output
    """
    xb = x_ref[...].astype(jnp.bfloat16)                       # in-kernel cast (VPU)
    h = jnp.dot(xb, w1_ref[...], preferred_element_type=jnp.float32)   # fc1 on MXU
    h = jnp.maximum(h + b1_ref[...], 0.0)                      # bias + ReLU in f32
    o_ref[...] = jnp.dot(h.astype(jnp.bfloat16), w2_ref[...],  # fc2 on MXU (lane-dense)
                         preferred_element_type=jnp.float32)


def network_forward(x, w1, b1, w2, b2, *, tile_batch=8192):
    """Forward pass of Network (PyTorch weight layouts).

    x:  (B, D) f32
    w1: (H, D) f32  (fc1.weight)     b1: (H,) f32  (fc1.bias)
    w2: (1, H) f32  (fc2.weight)     b2: (1,) f32  (fc2.bias)
    returns (B, 1) f32
    """
    B, D = x.shape
    H = w1.shape[0]

    # Pack `pack` consecutive samples into one lane-dense row.  The reshape is a
    # free row-major bitcast — NOT an extra HBM pass (unlike transposing x).
    pack = max(1, min(8, 128 // max(D, 1)))

    Bp = _round_up(B, pack)
    if Bp != B:
        # Only when B is not a multiple of `pack` (adds <= pack-1 rows).
        x = jnp.pad(x, ((0, Bp - B), (0, 0)))
    rows = Bp // pack
    xr = x.reshape(rows, pack * D)

    # Block-diagonal packed weights (tiny; hoist out of the wrapper if the same
    # weights are reused across many calls).
    eye = jnp.eye(pack, dtype=jnp.float32)
    w1f = w1.astype(jnp.float32)
    w1p = jnp.einsum("ij,kd->idjk", eye, w1f).reshape(pack * D, pack * H)
    w1p = w1p.astype(jnp.bfloat16)
    b1p = jnp.tile(b1.astype(jnp.float32), pack).reshape(1, pack * H)
    w2p = jnp.einsum("ij,k->ikj", eye, w2.reshape(H).astype(jnp.float32))
    w2p = w2p.reshape(pack * H, pack).astype(jnp.bfloat16)

    # Batch tiling: big tiles amortize per-step overhead; ragged last block OK.
    tile_rows = max(8, (tile_batch // pack) // 8 * 8)
    tile_rows = min(tile_rows, _round_up(rows, 8))
    num_tiles = pl.cdiv(rows, tile_rows)
    # NOTE(v7x): keep num_tiles >= 2 (batch >= 2*tile_batch) so the "parallel"
    # grid axis actually shards across both TensorCores.

    # Explicit VMEM budget (v7x: 64 MiB physical; v5e: 16 MiB default scoped).
    lane = lambda n: _round_up(n, 128)
    x_blk = tile_rows * lane(pack * D) * 4
    o_blk = tile_rows * lane(pack) * 4
    w_blk = (pack * D * lane(pack * H) * 2 + pack * H * lane(pack) * 2
             + 8 * lane(pack * H) * 4)
    h_tmp = tile_rows * lane(pack * H) * (4 + 2)          # f32 h + bf16 copy
    vmem_bytes = 2 * (x_blk + o_blk + w_blk) + h_tmp + x_blk // 2
    vmem_limit = int(min(max(32 * 1024 * 1024, 2 * vmem_bytes),
                         48 * 1024 * 1024))

    out_packed = pl.pallas_call(
        _mlp_kernel,
        out_shape=jax.ShapeDtypeStruct((rows, pack), jnp.float32),
        grid=(num_tiles,),
        in_specs=[
            pl.BlockSpec((tile_rows, pack * D), lambda i: (i, 0)),   # x tile
            pl.BlockSpec((pack * D, pack * H), lambda i: (0, 0)),    # fc1 W (resident)
            pl.BlockSpec((1, pack * H), lambda i: (0, 0)),           # fc1 bias
            pl.BlockSpec((pack * H, pack), lambda i: (0, 0)),        # fc2 W (resident)
        ],
        out_specs=pl.BlockSpec((tile_rows, pack), lambda i: (i, 0)),
        compiler_params=pltpu.CompilerParams(
            dimension_semantics=("parallel",),
            vmem_limit_bytes=vmem_limit),
        cost_estimate=pl.CostEstimate(
            flops=2 * Bp * D * H + 2 * Bp * H,
            transcendentals=0,
            bytes_accessed=(Bp * D * 4 + Bp * 4
                            + (pack * D) * (pack * H) * 2
                            + (pack * H) * pack * 2)),
    )(xr, w1p, b1p, w2p)

    # fc2 bias added here (scalar; fuses into the output reshape/slice).
    return out_packed.reshape(Bp, 1)[:B] + b2.reshape(1, 1)


def reference_forward_f32(x, w1, b1, w2, b2):
    h = jnp.maximum(x @ w1.T + b1[None, :], 0.0)
    return h @ w2.T + b2[None, :]


def reference_forward_bf16(x, w1, b1, w2, b2):
    # Mirror the kernel's bf16 MXU operands (accumulation / elementwise in f32).
    xb = x.astype(jnp.bfloat16).astype(jnp.float32)
    w1b = w1.astype(jnp.bfloat16).astype(jnp.float32)
    h = jnp.maximum(xb @ w1b.T + b1[None, :], 0.0)
    hb = h.astype(jnp.bfloat16).astype(jnp.float32)
    w2b = w2.astype(jnp.bfloat16).astype(jnp.float32)
    return hb @ w2b.T + b2[None, :]


if __name__ == "__main__":
    dim, hidden = 16, 32
    key = jax.random.PRNGKey(0)
    kx, k1, kb1, k2, kb2, kx2 = jax.random.split(key, 6)

    # PyTorch nn.Linear default init: U(-1/sqrt(fan_in), +1/sqrt(fan_in)).
    bound1 = dim ** -0.5
    w1 = jax.random.uniform(k1, (hidden, dim), minval=-bound1, maxval=bound1,
                            dtype=jnp.float32)          # fc1.weight (H, D)
    b1 = jax.random.uniform(kb1, (hidden,), minval=-bound1, maxval=bound1,
                            dtype=jnp.float32)          # fc1.bias (H,)
    bound2 = hidden ** -0.5
    w2 = jax.random.uniform(k2, (1, hidden), minval=-bound2, maxval=bound2,
                            dtype=jnp.float32)          # fc2.weight (1, H)
    b2 = jax.random.uniform(kb2, (1,), minval=-bound2, maxval=bound2,
                            dtype=jnp.float32)          # fc2.bias (1,)

    # Case 1: tiny batch (exercises the < pack padding and a single ragged block).
    batch = 2
    x = jax.random.normal(kx, (batch, dim), dtype=jnp.float32)
    out = jax.block_until_ready(network_forward(x, w1, b1, w2, b2))
    assert out.shape == (batch, 1)
    assert jnp.allclose(out, reference_forward_bf16(x, w1, b1, w2, b2),
                        atol=2e-3, rtol=2e-2), "case1: mismatch vs bf16 ref"
    assert jnp.allclose(out, reference_forward_f32(x, w1, b1, w2, b2),
                        atol=5e-2, rtol=5e-2), "case1: mismatch vs f32 ref"

    # Case 2: multi-tile grid with a ragged last block (no wrapper pad needed).
    batch2 = 1000
    x2 = jax.random.normal(kx2, (batch2, dim), dtype=jnp.float32)
    out2 = jax.block_until_ready(
        network_forward(x2, w1, b1, w2, b2, tile_batch=512))
    assert out2.shape == (batch2, 1)
    assert jnp.allclose(out2, reference_forward_bf16(x2, w1, b1, w2, b2),
                        atol=2e-3, rtol=2e-2), "case2: mismatch vs bf16 ref"
    assert jnp.allclose(out2, reference_forward_f32(x2, w1, b1, w2, b2),
                        atol=5e-2, rtol=5e-2), "case2: mismatch vs f32 ref"

    print("KERNEL_OK")
</pallas_src>

<mosaic_0001>
module attributes {stable_mosaic.version = 11 : i64} {
  func.func @_mlp_kernel(%arg0: i32, %arg1: memref<8x128xf32, #tpu.memory_space<vmem>>, %arg2: memref<128x256xbf16, #tpu.memory_space<vmem>>, %arg3: memref<1x256xf32, #tpu.memory_space<vmem>>, %arg4: memref<256x8xbf16, #tpu.memory_space<vmem>>, %arg5: memref<8x8xf32, #tpu.memory_space<vmem>>) attributes {dimension_semantics = [#tpu.dimension_semantics<parallel>], iteration_bounds = array<i64: 1>, scalar_prefetch = 0 : i64, scratch_operands = 0 : i64, tpu.core_type = #tpu.core_type<tc>, window_params = [{transform_indices = @transform_0, window_bounds = array<i64: 8, 128>}, {pipeline_mode = #tpu.pipeline_mode<synchronous>, transform_indices = @transform_1, window_bounds = array<i64: 128, 256>}, {pipeline_mode = #tpu.pipeline_mode<synchronous>, transform_indices = @transform_2, window_bounds = array<i64: 1, 256>}, {pipeline_mode = #tpu.pipeline_mode<synchronous>, transform_indices = @transform_3, window_bounds = array<i64: 256, 8>}, {transform_indices = @transform_4, window_bounds = array<i64: 8, 8>}]} {
    %c0 = arith.constant 0 : index
    %c0_0 = arith.constant 0 : index
    %0 = vector.load %arg1[%c0, %c0_0] : memref<8x128xf32, #tpu.memory_space<vmem>>, vector<8x128xf32>
    %1 = arith.truncf %0 : vector<8x128xf32> to vector<8x128xbf16>
    %c0_1 = arith.constant 0 : index
    %c0_2 = arith.constant 0 : index
    %2 = vector.load %arg2[%c0_1, %c0_2] : memref<128x256xbf16, #tpu.memory_space<vmem>>, vector<128x256xbf16>
    %cst = arith.constant dense<0.000000e+00> : vector<8x256xf32>
    %3 = tpu.matmul %1, %2, %cst {dimension_numbers = #tpu.dot_dimension_numbers<[1], [0], [0], [1], [0, 0, 1, 1], [], []>} : vector<8x128xbf16>, vector<128x256xbf16>, vector<8x256xf32> -> vector<8x256xf32>
    %c0_3 = arith.constant 0 : index
    %c0_4 = arith.constant 0 : index
    %4 = vector.load %arg3[%c0_3, %c0_4] : memref<1x256xf32, #tpu.memory_space<vmem>>, vector<1x256xf32>
    %5 = vector.broadcast %4 : vector<1x256xf32> to vector<8x256xf32>
    %6 = arith.addf %3, %5 : vector<8x256xf32>
    %cst_5 = arith.constant 0.000000e+00 : f32
    %7 = vector.broadcast %cst_5 : f32 to vector<8x256xf32>
    %8 = arith.maximumf %6, %7 : vector<8x256xf32>
    %9 = arith.truncf %8 : vector<8x256xf32> to vector<8x256xbf16>
    %c0_6 = arith.constant 0 : index
    %c0_7 = arith.constant 0 : index
    %10 = vector.load %arg4[%c0_6, %c0_7] : memref<256x8xbf16, #tpu.memory_space<vmem>>, vector<256x8xbf16>
    %cst_8 = arith.constant dense<0.000000e+00> : vector<8x8xf32>
    %11 = tpu.matmul %9, %10, %cst_8 {dimension_numbers = #tpu.dot_dimension_numbers<[1], [0], [0], [1], [0, 0, 1, 1], [], []>} : vector<8x256xbf16>, vector<256x8xbf16>, vector<8x8xf32> -> vector<8x8xf32>
    %c0_9 = arith.constant 0 : index
    %c0_10 = arith.constant 0 : index
    %12 = vector.load %arg5[%c0_9, %c0_10] : memref<8x8xf32, #tpu.memory_space<vmem>>, vector<8x8xf32>
    tpu.vector_store %arg5[%c0_9, %c0_10], %11 {strides = array<i32>} : memref<8x8xf32, #tpu.memory_space<vmem>>, vector<8x8xf32>,
    return
  }
  func.func @transform_0(%arg0: i32) -> (i32, i32) {
    %c0_i32 = arith.constant 0 : i32
    %c0_i32_0 = arith.constant 0 : i32
    return %arg0, %c0_i32 : i32, i32
  }
  func.func @transform_1(%arg0: i32) -> (i32, i32) {
    %c0_i32 = arith.constant 0 : i32
    %c0_i32_0 = arith.constant 0 : i32
    %c0_i32_1 = arith.constant 0 : i32
    return %c0_i32, %c0_i32_0 : i32, i32
  }
  func.func @transform_2(%arg0: i32) -> (i32, i32) {
    %c0_i32 = arith.constant 0 : i32
    %c0_i32_0 = arith.constant 0 : i32
    %c0_i32_1 = arith.constant 0 : i32
    return %c0_i32, %c0_i32_0 : i32, i32
  }
  func.func @transform_3(%arg0: i32) -> (i32, i32) {
    %c0_i32 = arith.constant 0 : i32
    %c0_i32_0 = arith.constant 0 : i32
    %c0_i32_1 = arith.constant 0 : i32
    return %c0_i32, %c0_i32_0 : i32, i32
  }
  func.func @transform_4(%arg0: i32) -> (i32, i32) {
    %c0_i32 = arith.constant 0 : i32
    %c0_i32_0 = arith.constant 0 : i32
    return %arg0, %c0_i32 : i32, i32
  }
}

</mosaic_0001>

<bundles_post_ra>
// kernel: tpu_custom_call.1
= control target key start
LH: loop header
LB: loop body
LE: loop exit
PB: predicated region body
PF: predicated region fallthrough
CT: control target
= control target key end

     0   :  { %9 = vsyncpa [#allocation3], 0  ;;  %v480_v2 = vmov 0   ;;  %v39_v35 = vlaneseq  ;;  %vm342_vm0 = vcmask 64512   ;;  %s614_s0 = inlined_call_operand.vmem [shape: f32[1,128], index: 0, kind: input, shape index: {}]   ;;  %s615_s1 = inlined_call_operand.vmem [shape: bf16[128,256], index: 1, kind: input, shape index: {}]   ;;  %s616_s2 = inlined_call_operand.vmem [shape: f32[1,256], index: 2, kind: input, shape index: {}]   ;;  %s617_s3 = inlined_call_operand.vmem [shape: bf16[256,8], index: 3, kind: input, shape index: {}]   ;;  %s618_s4 = inlined_call_operand.hbm [shape: f32[1,8], index: 4, kind: output, shape index: {}]  }
   0x1   :  { %v418_v0 = vld [vmem:[%s615_s1 + $0x74] ss:$8 sps:$4 sm:$0xff]   ;;  %v420_v1 = vld [vmem:[%s615_s1 + $0x70] ss:$8 sps:$4 sm:$0xff]   ;;  %161 = vmatprep.mubr.bf16.mxu0 %v480_v2  ;;  %v421_v3 = vld [vmem:[%s615_s1 + $0x64] ss:$8 sps:$4 sm:$0xff]  }
   0x2   :  { %129 = vmatprep.subr.bf16.mxu0 %v418_v0  ;;  %v423_v4 = vld [vmem:[%s615_s1 + $0x60] ss:$8 sps:$4 sm:$0xff]   ;;  %v424_v5 = vld [vmem:[%s615_s1 + $0x54] ss:$8 sps:$4 sm:$0xff]   ;;  %v426_v6 = vld [vmem:[%s615_s1 + $0x50] ss:$8 sps:$4 sm:$0xff]  }
   0x3   :  { %130 = vmatpush1.bf16.msra.mxu0 %v420_v1  ;;  %v427_v7 = vld [vmem:[%s615_s1 + $0x44] ss:$8 sps:$4 sm:$0xff]   ;;  %v429_v8 = vld [vmem:[%s615_s1 + $0x40] ss:$8 sps:$4 sm:$0xff]   ;;  %v430_v9 = vld [vmem:[%s615_s1 + $0x34] ss:$8 sps:$4 sm:$0xff]  }
   0x4   :  { %131 = vmatprep.subr.bf16.mxu0 %v421_v3  ;;  %v442_v10 = vld [vmem:[%s617_s3 + $0x78] sm:$0xff]   ;;  %v444_v13 = vld [vmem:[%s617_s3 + $0x70] sm:$0xff]   ;;  %v446_v15 = vld [vmem:[%s617_s3 + $0x68] sm:$0xff]   ;;  %v40_v36 = vshrl.u32 %v39_v35, 7 }
   0x5   :  { %v443_v11 = vld [vmem:[%s617_s3 + $0x38] sm:$0xff]   ;;  %392 = vmatprep.subr.bf16.mxu1 %v442_v10  ;;  %v445_v14 = vld [vmem:[%s617_s3 + $0x30] sm:$0xff]   ;;  %v433_v16 = vld [vmem:[%s615_s1 + $0x24] ss:$8 sps:$4 sm:$0xff]  }
   0x6   :  { %v432_v12 = vld [vmem:[%s615_s1 + $0x30] ss:$8 sps:$4 sm:$0xff]   ;;  %393 = vmatpush3.bf16.msra.mxu1 %v443_v11  ;;  %v435_v17 = vld [vmem:[%s615_s1 + $0x20] ss:$8 sps:$4 sm:$0xff]   ;;  %v436_v20 = vld [vmem:[%s615_s1 + $0x14] ss:$8 sps:$4 sm:$0xff]  }
   0x7   :  { %132 = vmatpush1.bf16.msra.mxu0 %v423_v4  ;;  %394 = vmatprep.subr.bf16.mxu1 %v444_v13  ;;  %v447_v18 = vld [vmem:[%s617_s3 + $0x28] sm:$0xff]   ;;  %v448_v19 = vld [vmem:[%s617_s3 + $0x60] sm:$0xff]   ;;  %v438_v21 = vld [vmem:[%s615_s1 + $0x10] ss:$8 sps:$4 sm:$0xff]   ;;  %v41_v37 = vsub.s32 0, %v40_v36  ;;  %v45_v39 = vsub.s32 1, %v40_v36 }
   0x8   :  { %133 = vmatprep.subr.bf16.mxu0 %v424_v5  ;;  %v439_v22 = vld [vmem:[%s615_s1 + $0x4] ss:$8 sps:$4 sm:$0xff]   ;;  %v450_v24 = vld [vmem:[%s617_s3 + $0x58] sm:$0xff]   ;;  %v441_v26 = vld [vmem:[%s615_s1] ss:$8 sps:$4 sm:$0xff]  }
   0x9   :  { %v449_v23 = vld [vmem:[%s617_s3 + $0x20] sm:$0xff]   ;;  %v451_v25 = vld [vmem:[%s617_s3 + $0x18] sm:$0xff]   ;;  %v452_v28 = vld [vmem:[%s617_s3 + $0x50] sm:$0xff]  }
   0xa   :  { %395 = vmatpush3.bf16.msra.mxu1 %v445_v14  ;;  %v19_v27 = vld [vmem:[%s614_s0] sm:$0xff]  ;;  %v453_v30 = vld [vmem:[%s617_s3 + $0x10] sm:$0xff]   ;;  %v454_v31 = vld [vmem:[%s617_s3 + $0x48] sm:$0xff]  }
   0xb   :  { %134 = vmatpush1.bf16.msra.mxu0 %v426_v6  ;;  %396 = vmatprep.subr.bf16.mxu1 %v446_v15  ;;  %v20_v29 = vpack.c.bf16 %v19_v27, %v19_v27  ;;  %v455_v32 = vld [vmem:[%s617_s3 + $0x8] sm:$0xff]   ;;  %v456_v33 = vld [vmem:[%s617_s3 + $0x40] sm:$0xff]  }
   0xc   :  { %135 = vmatprep.subr.bf16.mxu0 %v427_v7  ;;  %v457_v34 = vld [vmem:[%s617_s3] sm:$0xff]  }
   0xd   :  { %v37_v38 = vld [vmem:[%s616_s2] sm:$0x3] }
   0xe   :  { %397 = vmatpush3.bf16.msra.mxu1 %v447_v18  ;;  %v42_v40 = vrot.slane %v37_v38, %v41_v37  ;;  %v46_v41 = vrot.slane %v37_v38, %v45_v39 }
   0xf   :  { %136 = vmatpush1.bf16.msra.mxu0 %v429_v8  ;;  %398 = vmatprep.subr.bf16.mxu1 %v448_v19 }
  0x10   :  { %137 = vmatprep.subr.bf16.mxu0 %v430_v9 }
  0x12   :  { %399 = vmatpush3.bf16.msra.mxu1 %v449_v23 }
  0x13   :  { %138 = vmatpush1.bf16.msra.mxu0 %v432_v12  ;;  %400 = vmatprep.subr.bf16.mxu1 %v450_v24 }
  0x14   :  { %139 = vmatprep.subr.bf16.mxu0 %v433_v16 }
  0x16   :  { %401 = vmatpush3.bf16.msra.mxu1 %v451_v25 }
  0x17   :  { %140 = vmatpush1.bf16.msra.mxu0 %v435_v17  ;;  %402 = vmatprep.subr.bf16.mxu1 %v452_v28 }
  0x18   :  { %141 = vmatprep.subr.bf16.mxu0 %v436_v20 }
  0x1a   :  { %403 = vmatpush3.bf16.msra.mxu1 %v453_v30 }
  0x1b   :  { %142 = vmatpush1.bf16.msra.mxu0 %v438_v21  ;;  %404 = vmatprep.subr.bf16.mxu1 %v454_v31 }
  0x1c   :  { %143 = vmatprep.subr.bf16.mxu0 %v439_v22 }
  0x1e   :  { %405 = vmatpush3.bf16.msra.mxu1 %v455_v32 }
  0x1f   :  { %144 = vmatpush1.bf16.msra.mxu0 %v441_v26  ;;  %406 = vmatprep.subr.bf16.mxu1 %v456_v33 }
  0x22   :  { %162 = vmatmul.mubr.bf16.vlgmr.msra.gmra.mxu0 %v20_v29  ;;  %407 = vmatpush3.bf16.msra.mxu1 %v457_v34 }
  0xe2   :  { %v163_v42 = vpop.f32.mrf.mxu0 }
  0xe3   :  { %v164_v43 = vadd.f32 %v163_v42, %v42_v40 }
  0xe4   :  { %v165_v44 = vpop.f32.mrf.mxu0 }
  0xe5   :  { %v166_v45 = vadd.f32 %v165_v44, %v46_v41  ;;  %v170_v46 = vmax.f32 %v164_v43, 0.0 }
  0xe6   :  { %v167_v47 = vpop.f32.mrf.mxu0 }
  0xe7   :  { %v171_v48 = vmax.f32 %v166_v45, 0.0  ;;  %v172_v51 = vpack.c.bf16 %v170_v46, %v170_v46 }
  0xe8   :  { %v168_v49 = vpop.f32.mrf.mxu0 }
  0xe9   :  { %v173_v50 = vpack.c.bf16 %v171_v48, %v171_v48 }
  0xeb   :  { %334 = vmatprep.mubr.bf16.mxu1 %v173_v50 }
  0xec   :  { %335 = vmatmul.mubr.bf16.vlgmr.msra.gmra.mxu1 %v172_v51 }
 0x1ac   :  { %v408_v52 = vpop.f32.mrf.mxu1 }
 0x1ae   :  { %v409_v53 = vpop.f32.mrf.mxu1 }
 0x1af   :  { %v410_v54 = vadd.f32 %v409_v53, %v408_v52 }
 0x1b0   :  { %v411_v55 = vpop.f32.mrf.mxu1 }
 0x1b1   :  { %343 = vst.msk [vmem:[#allocation2] sm:$0xff] %vm342_vm0, %v410_v54 }
 0x1b2   :  { %v412_v56 = vpop.f32.mrf.mxu1 }
 0x1b3   :  { %348 = vsyncadd [#allocation3], 112  ;;  %s481_s2 = smov [#allocation2]  }
 0x1b4   :  { %s349_s3 = sshll.u32 %s481_s2, 4  ;;  %s350_s3 = int_to_ptr.vmem [resolvable:$true] %s349_s3 }
 0x1b5   :  { %s458_s29 = scalar_lea.vmem %s350_s3, 16  ;;  %s462_s30 = scalar_lea.vmem %s350_s3, 128 }
 0x1b6   :  { %p459_p0 = scmp.ne.s32.totalorder %s350_s3, %s458_s29  ;;  %p463_p1 = scmp.lt.s32.totalorder %s350_s3, %s350_s3 }
 0x1b7   :  { %p464_p2 = scmp.lt.s32.totalorder %s462_s30, %s458_s29 }
 0x1b9   :  { %p465_p3 = por %p464_p2, %p463_p1 }
 0x1bb   :  { %p466_p4 = pnand %p465_p3, %p459_p0 }
 0x1bd   :  { %469 = shalt.err (!%p466_p4)
}
 0x1be   :  { %s482_s5 = smov 16   ;;  %s483_s6 = smov 1  }
 0x1bf   :  { %355 = dma.vmem_to_hbm [thread:$0]  %s350_s3, 16, %s618_s4, [#allocation3], %s482_s5, %s482_s5, %s483_s6  }
 0x1c0   :  { %478 = dma.done.wait [#allocation3], 128  }
 0x1c1   :  { %479 = vsyncadd [#allocation3], 4294967168 }
 0x1c2   :  { %359 = vsyncpa [#allocation3], 1 }

</bundles_post_ra>
